<compile_context>
chip_gen: v7x
topology: tpu7x:2x2x1
jax: 0.10.0
libtpu: 0.0.40
codegen_flags: <defaults>
</compile_context>

<pallas_src>
import functools

import jax
import jax.numpy as jnp
from jax.experimental import pallas as pl
from jax.experimental.pallas import tpu as pltpu


def _round_up(n: int, m: int) -> int:
    return ((n + m - 1) // m) * m


def qnet_kernel(xT_ref, w1_ref, b1_ref, w2_ref, b2_ref, qT_ref):
    """Tiny 2-layer MLP, batch on the lane axis.

    xT_ref : (in_dim, TILE_B)   VMEM (streamed per grid step)
    w1_ref : (h_dim, in_dim)    SMEM (resident, native torch layout)
    b1_ref : (h_dim,)           SMEM (resident)
    w2_ref : (out_dim, h_dim)   SMEM (resident)
    b2_ref : (out_dim,)         SMEM (resident)
    qT_ref : (out_dim, TILE_B)  VMEM (lane-dense output tile)
    """
    in_dim = xT_ref.shape[0]
    h_dim = w1_ref.shape[0]
    out_dim = w2_ref.shape[0]

    xT = xT_ref[...]  # (in_dim, TILE_B) f32

    # fc1 + ReLU: h[j, :] = relu(sum_k w1[j, k] * x[k, :] + b1[j])
    h_rows = []
    for j in range(h_dim):
        acc = xT[0:1, :] * w1_ref[j, 0]
        for k in range(1, in_dim):
            acc = acc + xT[k:k + 1, :] * w1_ref[j, k]
        h_rows.append(jnp.maximum(acc + b1_ref[j], 0.0))

    # fc2 + ReLU: q[j, :] = relu(sum_k w2[j, k] * h[k, :] + b2[j])
    q_rows = []
    for j in range(out_dim):
        acc = h_rows[0] * w2_ref[j, 0]
        for k in range(1, h_dim):
            acc = acc + h_rows[k] * w2_ref[j, k]
        q_rows.append(jnp.maximum(acc + b2_ref[j], 0.0))

    qT_ref[...] = jnp.concatenate(q_rows, axis=0).astype(qT_ref.dtype)


@functools.partial(jax.jit, static_argnames=("tile_b",))
def qnet_forward(x, w1, b1, w2, b2, tile_b=512):
    """x: (B, in_dim); w1: (h_dim, in_dim); b1: (h_dim,); w2: (out_dim, h_dim); b2: (out_dim,)."""
    B, in_dim = x.shape
    h_dim = w1.shape[0]
    out_dim = w2.shape[0]

    # Lane-dense batch tile; pad batch up to a multiple of it.
    tb = min(tile_b, _round_up(B, 128))
    Bp = _round_up(B, tb)
    grid = (Bp // tb,)

    # Layout plumbing only: put batch on the lane (last) axis for x and q.
    xT = jnp.transpose(jnp.pad(x, ((0, Bp - B), (0, 0))))  # (in_dim, Bp)

    smem_spec = pl.BlockSpec(memory_space=pltpu.MemorySpace.SMEM)

    cost = pl.CostEstimate(
        flops=2 * Bp * (in_dim * h_dim + h_dim * out_dim),
        transcendentals=0,
        bytes_accessed=4 * (Bp * in_dim + Bp * out_dim
                            + h_dim * in_dim + h_dim
                            + out_dim * h_dim + out_dim),
    )

    qT = pl.pallas_call(
        qnet_kernel,
        out_shape=jax.ShapeDtypeStruct((out_dim, Bp), jnp.float32),
        grid=grid,
        in_specs=[
            pl.BlockSpec((in_dim, tb), lambda i: (0, i)),  # x tile: streamed over batch
            smem_spec,  # w1 resident
            smem_spec,  # b1 resident
            smem_spec,  # w2 resident
            smem_spec,  # b2 resident
        ],
        out_specs=pl.BlockSpec((out_dim, tb), lambda i: (0, i)),  # lane-dense q tile
        compiler_params=pltpu.CompilerParams(
            dimension_semantics=("parallel",),       # megacore sharding on v7x
            vmem_limit_bytes=32 * 1024 * 1024,        # explicit, safe on v5e/v6e/v7x
        ),
        cost_estimate=cost,
    )(xT, w1, b1, w2, b2)

    return jnp.transpose(qT)[:B, :]  # (B, out_dim)


def qnet_reference(x, w1, b1, w2, b2):
    h = jnp.maximum(x @ w1.T + b1, 0.0)
    return jnp.maximum(h @ w2.T + b2, 0.0)


if __name__ == "__main__":
    # CartPole-style dims: in_dim=4 (state), h_dim=in_dim=4, out_dim=2 (actions).
    in_dim, out_dim = 4, 2
    h_dim = in_dim

    key = jax.random.PRNGKey(0)
    k_x, k_w1, k_b1, k_w2, k_b2, k_x2 = jax.random.split(key, 6)

    # Deterministic parameter init (uniform +-1/sqrt(fan_in), like torch.nn.Linear).
    bound1 = 1.0 / jnp.sqrt(in_dim)
    bound2 = 1.0 / jnp.sqrt(h_dim)
    w1 = jax.random.uniform(k_w1, (h_dim, in_dim), jnp.float32, -bound1, bound1)
    b1 = jax.random.uniform(k_b1, (h_dim,), jnp.float32, -bound1, bound1)
    w2 = jax.random.uniform(k_w2, (out_dim, h_dim), jnp.float32, -bound2, bound2)
    b2 = jax.random.uniform(k_b2, (out_dim,), jnp.float32, -bound2, bound2)

    # Small demo batch (single grid step).
    batch = 8
    x = jax.random.normal(k_x, (batch, in_dim), jnp.float32)
    q = jax.block_until_ready(qnet_forward(x, w1, b1, w2, b2))
    q_ref = qnet_reference(x, w1, b1, w2, b2)
    assert q.shape == (batch, out_dim)
    assert jnp.allclose(q, q_ref, atol=1e-5, rtol=1e-5)

    # Larger, non-multiple-of-tile batch (exercises the batch grid + padding path).
    batch2 = 1300
    x2 = jax.random.normal(k_x2, (batch2, in_dim), jnp.float32)
    q2 = jax.block_until_ready(qnet_forward(x2, w1, b1, w2, b2))
    q2_ref = qnet_reference(x2, w1, b1, w2, b2)
    assert q2.shape == (batch2, out_dim)
    assert jnp.allclose(q2, q2_ref, atol=1e-5, rtol=1e-5)

    print("KERNEL_OK")
</pallas_src>

<mosaic_0001>
module attributes {stable_mosaic.version = 11 : i64} {
  func.func @qnet_kernel(%arg0: i32, %arg1: memref<4x128xf32, #tpu.memory_space<vmem>>, %arg2: memref<4x4xf32, #tpu.memory_space<smem>>, %arg3: memref<4xf32, #tpu.memory_space<smem>>, %arg4: memref<2x4xf32, #tpu.memory_space<smem>>, %arg5: memref<2xf32, #tpu.memory_space<smem>>, %arg6: memref<2x128xf32, #tpu.memory_space<vmem>>) attributes {dimension_semantics = [#tpu.dimension_semantics<parallel>], iteration_bounds = array<i64: 1>, scalar_prefetch = 0 : i64, scratch_operands = 0 : i64, tpu.core_type = #tpu.core_type<tc>, window_params = [{transform_indices = @transform_0, window_bounds = array<i64: 4, 128>}, {transform_indices = @transform_1, window_bounds = array<i64: 4, 4>}, {transform_indices = @transform_2, window_bounds = array<i64: 4>}, {transform_indices = @transform_3, window_bounds = array<i64: 2, 4>}, {transform_indices = @transform_4, window_bounds = array<i64: 2>}, {transform_indices = @transform_5, window_bounds = array<i64: 2, 128>}]} {
    %c0 = arith.constant 0 : index
    %c0_0 = arith.constant 0 : index
    %0 = vector.load %arg1[%c0, %c0_0] : memref<4x128xf32, #tpu.memory_space<vmem>>, vector<4x128xf32>
    %1 = vector.extract_strided_slice %0 {offsets = [0, 0], sizes = [1, 128], strides = [1, 1]} : vector<4x128xf32> to vector<1x128xf32>
    %c0_1 = arith.constant 0 : index
    %c0_2 = arith.constant 0 : index
    %2 = memref.load %arg2[%c0_1, %c0_2] : memref<4x4xf32, #tpu.memory_space<smem>>
    %3 = vector.broadcast %2 : f32 to vector<1x128xf32>
    %4 = arith.mulf %1, %3 : vector<1x128xf32>
    %5 = vector.extract_strided_slice %0 {offsets = [1, 0], sizes = [1, 128], strides = [1, 1]} : vector<4x128xf32> to vector<1x128xf32>
    %c0_3 = arith.constant 0 : index
    %c1 = arith.constant 1 : index
    %6 = memref.load %arg2[%c0_3, %c1] : memref<4x4xf32, #tpu.memory_space<smem>>
    %7 = vector.broadcast %6 : f32 to vector<1x128xf32>
    %8 = arith.mulf %5, %7 : vector<1x128xf32>
    %9 = arith.addf %4, %8 : vector<1x128xf32>
    %10 = vector.extract_strided_slice %0 {offsets = [2, 0], sizes = [1, 128], strides = [1, 1]} : vector<4x128xf32> to vector<1x128xf32>
    %c0_4 = arith.constant 0 : index
    %c2 = arith.constant 2 : index
    %11 = memref.load %arg2[%c0_4, %c2] : memref<4x4xf32, #tpu.memory_space<smem>>
    %12 = vector.broadcast %11 : f32 to vector<1x128xf32>
    %13 = arith.mulf %10, %12 : vector<1x128xf32>
    %14 = arith.addf %9, %13 : vector<1x128xf32>
    %15 = vector.extract_strided_slice %0 {offsets = [3, 0], sizes = [1, 128], strides = [1, 1]} : vector<4x128xf32> to vector<1x128xf32>
    %c0_5 = arith.constant 0 : index
    %c3 = arith.constant 3 : index
    %16 = memref.load %arg2[%c0_5, %c3] : memref<4x4xf32, #tpu.memory_space<smem>>
    %17 = vector.broadcast %16 : f32 to vector<1x128xf32>
    %18 = arith.mulf %15, %17 : vector<1x128xf32>
    %19 = arith.addf %14, %18 : vector<1x128xf32>
    %c0_6 = arith.constant 0 : index
    %20 = memref.load %arg3[%c0_6] : memref<4xf32, #tpu.memory_space<smem>>
    %21 = vector.broadcast %20 : f32 to vector<1x128xf32>
    %22 = arith.addf %19, %21 : vector<1x128xf32>
    %cst = arith.constant 0.000000e+00 : f32
    %23 = vector.broadcast %cst : f32 to vector<1x128xf32>
    %24 = arith.maximumf %22, %23 : vector<1x128xf32>
    %25 = vector.extract_strided_slice %0 {offsets = [0, 0], sizes = [1, 128], strides = [1, 1]} : vector<4x128xf32> to vector<1x128xf32>
    %c1_7 = arith.constant 1 : index
    %c0_8 = arith.constant 0 : index
    %26 = memref.load %arg2[%c1_7, %c0_8] : memref<4x4xf32, #tpu.memory_space<smem>>
    %27 = vector.broadcast %26 : f32 to vector<1x128xf32>
    %28 = arith.mulf %25, %27 : vector<1x128xf32>
    %29 = vector.extract_strided_slice %0 {offsets = [1, 0], sizes = [1, 128], strides = [1, 1]} : vector<4x128xf32> to vector<1x128xf32>
    %c1_9 = arith.constant 1 : index
    %c1_10 = arith.constant 1 : index
    %30 = memref.load %arg2[%c1_9, %c1_10] : memref<4x4xf32, #tpu.memory_space<smem>>
    %31 = vector.broadcast %30 : f32 to vector<1x128xf32>
    %32 = arith.mulf %29, %31 : vector<1x128xf32>
    %33 = arith.addf %28, %32 : vector<1x128xf32>
    %34 = vector.extract_strided_slice %0 {offsets = [2, 0], sizes = [1, 128], strides = [1, 1]} : vector<4x128xf32> to vector<1x128xf32>
    %c1_11 = arith.constant 1 : index
    %c2_12 = arith.constant 2 : index
    %35 = memref.load %arg2[%c1_11, %c2_12] : memref<4x4xf32, #tpu.memory_space<smem>>
    %36 = vector.broadcast %35 : f32 to vector<1x128xf32>
    %37 = arith.mulf %34, %36 : vector<1x128xf32>
    %38 = arith.addf %33, %37 : vector<1x128xf32>
    %39 = vector.extract_strided_slice %0 {offsets = [3, 0], sizes = [1, 128], strides = [1, 1]} : vector<4x128xf32> to vector<1x128xf32>
    %c1_13 = arith.constant 1 : index
    %c3_14 = arith.constant 3 : index
    %40 = memref.load %arg2[%c1_13, %c3_14] : memref<4x4xf32, #tpu.memory_space<smem>>
    %41 = vector.broadcast %40 : f32 to vector<1x128xf32>
    %42 = arith.mulf %39, %41 : vector<1x128xf32>
    %43 = arith.addf %38, %42 : vector<1x128xf32>
    %c1_15 = arith.constant 1 : index
    %44 = memref.load %arg3[%c1_15] : memref<4xf32, #tpu.memory_space<smem>>
    %45 = vector.broadcast %44 : f32 to vector<1x128xf32>
    %46 = arith.addf %43, %45 : vector<1x128xf32>
    %cst_16 = arith.constant 0.000000e+00 : f32
    %47 = vector.broadcast %cst_16 : f32 to vector<1x128xf32>
    %48 = arith.maximumf %46, %47 : vector<1x128xf32>
    %49 = vector.extract_strided_slice %0 {offsets = [0, 0], sizes = [1, 128], strides = [1, 1]} : vector<4x128xf32> to vector<1x128xf32>
    %c2_17 = arith.constant 2 : index
    %c0_18 = arith.constant 0 : index
    %50 = memref.load %arg2[%c2_17, %c0_18] : memref<4x4xf32, #tpu.memory_space<smem>>
    %51 = vector.broadcast %50 : f32 to vector<1x128xf32>
    %52 = arith.mulf %49, %51 : vector<1x128xf32>
    %53 = vector.extract_strided_slice %0 {offsets = [1, 0], sizes = [1, 128], strides = [1, 1]} : vector<4x128xf32> to vector<1x128xf32>
    %c2_19 = arith.constant 2 : index
    %c1_20 = arith.constant 1 : index
    %54 = memref.load %arg2[%c2_19, %c1_20] : memref<4x4xf32, #tpu.memory_space<smem>>
    %55 = vector.broadcast %54 : f32 to vector<1x128xf32>
    %56 = arith.mulf %53, %55 : vector<1x128xf32>
    %57 = arith.addf %52, %56 : vector<1x128xf32>
    %58 = vector.extract_strided_slice %0 {offsets = [2, 0], sizes = [1, 128], strides = [1, 1]} : vector<4x128xf32> to vector<1x128xf32>
    %c2_21 = arith.constant 2 : index
    %c2_22 = arith.constant 2 : index
    %59 = memref.load %arg2[%c2_21, %c2_22] : memref<4x4xf32, #tpu.memory_space<smem>>
    %60 = vector.broadcast %59 : f32 to vector<1x128xf32>
    %61 = arith.mulf %58, %60 : vector<1x128xf32>
    %62 = arith.addf %57, %61 : vector<1x128xf32>
    %63 = vector.extract_strided_slice %0 {offsets = [3, 0], sizes = [1, 128], strides = [1, 1]} : vector<4x128xf32> to vector<1x128xf32>
    %c2_23 = arith.constant 2 : index
    %c3_24 = arith.constant 3 : index
    %64 = memref.load %arg2[%c2_23, %c3_24] : memref<4x4xf32, #tpu.memory_space<smem>>
    %65 = vector.broadcast %64 : f32 to vector<1x128xf32>
    %66 = arith.mulf %63, %65 : vector<1x128xf32>
    %67 = arith.addf %62, %66 : vector<1x128xf32>
    %c2_25 = arith.constant 2 : index
    %68 = memref.load %arg3[%c2_25] : memref<4xf32, #tpu.memory_space<smem>>
    %69 = vector.broadcast %68 : f32 to vector<1x128xf32>
    %70 = arith.addf %67, %69 : vector<1x128xf32>
    %cst_26 = arith.constant 0.000000e+00 : f32
    %71 = vector.broadcast %cst_26 : f32 to vector<1x128xf32>
    %72 = arith.maximumf %70, %71 : vector<1x128xf32>
    %73 = vector.extract_strided_slice %0 {offsets = [0, 0], sizes = [1, 128], strides = [1, 1]} : vector<4x128xf32> to vector<1x128xf32>
    %c3_27 = arith.constant 3 : index
    %c0_28 = arith.constant 0 : index
    %74 = memref.load %arg2[%c3_27, %c0_28] : memref<4x4xf32, #tpu.memory_space<smem>>
    %75 = vector.broadcast %74 : f32 to vector<1x128xf32>
    %76 = arith.mulf %73, %75 : vector<1x128xf32>
    %77 = vector.extract_strided_slice %0 {offsets = [1, 0], sizes = [1, 128], strides = [1, 1]} : vector<4x128xf32> to vector<1x128xf32>
    %c3_29 = arith.constant 3 : index
    %c1_30 = arith.constant 1 : index
    %78 = memref.load %arg2[%c3_29, %c1_30] : memref<4x4xf32, #tpu.memory_space<smem>>
    %79 = vector.broadcast %78 : f32 to vector<1x128xf32>
    %80 = arith.mulf %77, %79 : vector<1x128xf32>
    %81 = arith.addf %76, %80 : vector<1x128xf32>
    %82 = vector.extract_strided_slice %0 {offsets = [2, 0], sizes = [1, 128], strides = [1, 1]} : vector<4x128xf32> to vector<1x128xf32>
    %c3_31 = arith.constant 3 : index
    %c2_32 = arith.constant 2 : index
    %83 = memref.load %arg2[%c3_31, %c2_32] : memref<4x4xf32, #tpu.memory_space<smem>>
    %84 = vector.broadcast %83 : f32 to vector<1x128xf32>
    %85 = arith.mulf %82, %84 : vector<1x128xf32>
    %86 = arith.addf %81, %85 : vector<1x128xf32>
    %87 = vector.extract_strided_slice %0 {offsets = [3, 0], sizes = [1, 128], strides = [1, 1]} : vector<4x128xf32> to vector<1x128xf32>
    %c3_33 = arith.constant 3 : index
    %c3_34 = arith.constant 3 : index
    %88 = memref.load %arg2[%c3_33, %c3_34] : memref<4x4xf32, #tpu.memory_space<smem>>
    %89 = vector.broadcast %88 : f32 to vector<1x128xf32>
    %90 = arith.mulf %87, %89 : vector<1x128xf32>
    %91 = arith.addf %86, %90 : vector<1x128xf32>
    %c3_35 = arith.constant 3 : index
    %92 = memref.load %arg3[%c3_35] : memref<4xf32, #tpu.memory_space<smem>>
    %93 = vector.broadcast %92 : f32 to vector<1x128xf32>
    %94 = arith.addf %91, %93 : vector<1x128xf32>
    %cst_36 = arith.constant 0.000000e+00 : f32
    %95 = vector.broadcast %cst_36 : f32 to vector<1x128xf32>
    %96 = arith.maximumf %94, %95 : vector<1x128xf32>
    %c0_37 = arith.constant 0 : index
    %c0_38 = arith.constant 0 : index
    %97 = memref.load %arg4[%c0_37, %c0_38] : memref<2x4xf32, #tpu.memory_space<smem>>
    %98 = vector.broadcast %97 : f32 to vector<1x128xf32>
    %99 = arith.mulf %24, %98 : vector<1x128xf32>
    %c0_39 = arith.constant 0 : index
    %c1_40 = arith.constant 1 : index
    %100 = memref.load %arg4[%c0_39, %c1_40] : memref<2x4xf32, #tpu.memory_space<smem>>
    %101 = vector.broadcast %100 : f32 to vector<1x128xf32>
    %102 = arith.mulf %48, %101 : vector<1x128xf32>
    %103 = arith.addf %99, %102 : vector<1x128xf32>
    %c0_41 = arith.constant 0 : index
    %c2_42 = arith.constant 2 : index
    %104 = memref.load %arg4[%c0_41, %c2_42] : memref<2x4xf32, #tpu.memory_space<smem>>
    %105 = vector.broadcast %104 : f32 to vector<1x128xf32>
    %106 = arith.mulf %72, %105 : vector<1x128xf32>
    %107 = arith.addf %103, %106 : vector<1x128xf32>
    %c0_43 = arith.constant 0 : index
    %c3_44 = arith.constant 3 : index
    %108 = memref.load %arg4[%c0_43, %c3_44] : memref<2x4xf32, #tpu.memory_space<smem>>
    %109 = vector.broadcast %108 : f32 to vector<1x128xf32>
    %110 = arith.mulf %96, %109 : vector<1x128xf32>
    %111 = arith.addf %107, %110 : vector<1x128xf32>
    %c0_45 = arith.constant 0 : index
    %112 = memref.load %arg5[%c0_45] : memref<2xf32, #tpu.memory_space<smem>>
    %113 = vector.broadcast %112 : f32 to vector<1x128xf32>
    %114 = arith.addf %111, %113 : vector<1x128xf32>
    %cst_46 = arith.constant 0.000000e+00 : f32
    %115 = vector.broadcast %cst_46 : f32 to vector<1x128xf32>
    %116 = arith.maximumf %114, %115 : vector<1x128xf32>
    %c1_47 = arith.constant 1 : index
    %c0_48 = arith.constant 0 : index
    %117 = memref.load %arg4[%c1_47, %c0_48] : memref<2x4xf32, #tpu.memory_space<smem>>
    %118 = vector.broadcast %117 : f32 to vector<1x128xf32>
    %119 = arith.mulf %24, %118 : vector<1x128xf32>
    %c1_49 = arith.constant 1 : index
    %c1_50 = arith.constant 1 : index
    %120 = memref.load %arg4[%c1_49, %c1_50] : memref<2x4xf32, #tpu.memory_space<smem>>
    %121 = vector.broadcast %120 : f32 to vector<1x128xf32>
    %122 = arith.mulf %48, %121 : vector<1x128xf32>
    %123 = arith.addf %119, %122 : vector<1x128xf32>
    %c1_51 = arith.constant 1 : index
    %c2_52 = arith.constant 2 : index
    %124 = memref.load %arg4[%c1_51, %c2_52] : memref<2x4xf32, #tpu.memory_space<smem>>
    %125 = vector.broadcast %124 : f32 to vector<1x128xf32>
    %126 = arith.mulf %72, %125 : vector<1x128xf32>
    %127 = arith.addf %123, %126 : vector<1x128xf32>
    %c1_53 = arith.constant 1 : index
    %c3_54 = arith.constant 3 : index
    %128 = memref.load %arg4[%c1_53, %c3_54] : memref<2x4xf32, #tpu.memory_space<smem>>
    %129 = vector.broadcast %128 : f32 to vector<1x128xf32>
    %130 = arith.mulf %96, %129 : vector<1x128xf32>
    %131 = arith.addf %127, %130 : vector<1x128xf32>
    %c1_55 = arith.constant 1 : index
    %132 = memref.load %arg5[%c1_55] : memref<2xf32, #tpu.memory_space<smem>>
    %133 = vector.broadcast %132 : f32 to vector<1x128xf32>
    %134 = arith.addf %131, %133 : vector<1x128xf32>
    %cst_56 = arith.constant 0.000000e+00 : f32
    %135 = vector.broadcast %cst_56 : f32 to vector<1x128xf32>
    %136 = arith.maximumf %134, %135 : vector<1x128xf32>
    %137 = tpu.concatenate %116, %136 in 0 : vector<1x128xf32>, vector<1x128xf32> -> vector<2x128xf32>
    %c0_57 = arith.constant 0 : index
    %c0_58 = arith.constant 0 : index
    %138 = vector.load %arg6[%c0_57, %c0_58] : memref<2x128xf32, #tpu.memory_space<vmem>>, vector<2x128xf32>
    tpu.vector_store %arg6[%c0_57, %c0_58], %137 {strides = array<i32>} : memref<2x128xf32, #tpu.memory_space<vmem>>, vector<2x128xf32>,
    return
  }
  func.func @transform_0(%arg0: i32) -> (i32, i32) {
    %c0_i32 = arith.constant 0 : i32
    %c0_i32_0 = arith.constant 0 : i32
    return %c0_i32, %arg0 : i32, i32
  }
  func.func @transform_1(%arg0: i32) -> (i32, i32) {
    %c0_i32 = arith.constant 0 : i32
    %c0_i32_0 = arith.constant 0 : i32
    %c0_i32_1 = arith.constant 0 : i32
    return %c0_i32, %c0_i32_0 : i32, i32
  }
  func.func @transform_2(%arg0: i32) -> i32 {
    %c0_i32 = arith.constant 0 : i32
    %c0_i32_0 = arith.constant 0 : i32
    return %c0_i32 : i32
  }
  func.func @transform_3(%arg0: i32) -> (i32, i32) {
    %c0_i32 = arith.constant 0 : i32
    %c0_i32_0 = arith.constant 0 : i32
    %c0_i32_1 = arith.constant 0 : i32
    return %c0_i32, %c0_i32_0 : i32, i32
  }
  func.func @transform_4(%arg0: i32) -> i32 {
    %c0_i32 = arith.constant 0 : i32
    %c0_i32_0 = arith.constant 0 : i32
    return %c0_i32 : i32
  }
  func.func @transform_5(%arg0: i32) -> (i32, i32) {
    %c0_i32 = arith.constant 0 : i32
    %c0_i32_0 = arith.constant 0 : i32
    return %c0_i32, %arg0 : i32, i32
  }
}

</mosaic_0001>

<bundles_post_ra>
// kernel: qnet_forward.1
= control target key start
LH: loop header
LB: loop body
LE: loop exit
PB: predicated region body
PF: predicated region fallthrough
CT: control target
= control target key end

     0   :  { %10 = vsyncpa [#allocation4], 0  ;;  %s495_s0 = inlined_call_operand.vmem [shape: f32[4,128], index: 0, kind: input, shape index: {}]   ;;  %s496_s1 = inlined_call_operand.vmem [shape: f32[4,4], index: 1, kind: input, shape index: {}]   ;;  %s497_s2 = inlined_call_operand.vmem [shape: f32[4], index: 2, kind: input, shape index: {}]   ;;  %s498_s3 = inlined_call_operand.vmem [shape: f32[2,4], index: 3, kind: input, shape index: {}]   ;;  %s499_s4 = inlined_call_operand.vmem [shape: f32[2], index: 4, kind: input, shape index: {}]   ;;  %s500_s5 = inlined_call_operand.hbm [shape: f32[2,128], index: 5, kind: output, shape index: {}]  }
   0x1   :  { %11 = vsyncpa [#allocation6], 0 }
   0x2   :  { %12 = vsyncpa [#allocation9], 0  ;;  %s32_s20 = sshll.u32 %s497_s2, 4  ;;  %s33_s20 = int_to_ptr.vmem [resolvable:$true] %s32_s20 }
   0x3   :  { %13 = vsyncpa [#allocation3], 0  ;;  %s22_s23 = sshll.u32 %s496_s1, 4  ;;  %s274_s24 = scalar_lea.vmem %s33_s20, 16  ;;  %s23_s23 = int_to_ptr.vmem [resolvable:$true] %s22_s23 }
   0x4   :  { %p275_p0 = scmp.ne.s32.totalorder %s33_s20, %s274_s24  ;;  %p279_p1 = scmp.lt.s32.totalorder %s33_s20, %s33_s20 }
   0x5   :  { %p280_p2 = scmp.lt.s32.totalorder %s274_s24, %s274_s24 }
   0x7   :  { %p281_p3 = por %p280_p2, %p279_p1 }
   0x9   :  { %p282_p4 = pnand %p281_p3, %p275_p0 }
   0xb   :  { %285 = shalt.err (!%p282_p4)
}
   0xc   :  { %s352_s25 = smov [#allocation5]   ;;  %s286_s26 = scalar_lea.vmem %s23_s23, 64 }
   0xd   :  { %35 = dma.vmem_to_smem %s33_s20, 16, %s352_s25, [#allocation6]  }
   0xe   :  { %p287_p5 = scmp.ne.s32.totalorder %s23_s23, %s286_s26  ;;  %p291_p6 = scmp.lt.s32.totalorder %s23_s23, %s23_s23 }
   0xf   :  { %p292_p7 = scmp.lt.s32.totalorder %s286_s26, %s286_s26 }
  0x11   :  { %p293_p8 = por %p292_p7, %p291_p6 }
  0x13   :  { %p294_p9 = pnand %p293_p8, %p287_p5 }
  0x15   :  { %297 = shalt.err (!%p294_p9)
}
  0x16   :  { %s353_s2 = smov [#allocation2]   ;;  %s42_s28 = sshll.u32 %s498_s3, 4  ;;  %s43_s28 = int_to_ptr.vmem [resolvable:$true] %s42_s28 }
  0x17   :  { %25 = dma.vmem_to_smem %s23_s23, 64, %s353_s2, [#allocation4]  }
  0x18   :  { %s52_s6 = sshll.u32 %s499_s4, 4  ;;  %s298_s7 = scalar_lea.vmem %s43_s28, 32  ;;  %s53_s6 = int_to_ptr.vmem [resolvable:$true] %s52_s6 }
  0x19   :  { %p299_p10 = scmp.ne.s32.totalorder %s43_s28, %s298_s7  ;;  %p303_p11 = scmp.lt.s32.totalorder %s43_s28, %s43_s28 }
  0x1a   :  { %p304_p12 = scmp.lt.s32.totalorder %s298_s7, %s298_s7 }
  0x1c   :  { %p305_p13 = por %p304_p12, %p303_p11 }
  0x1e   :  { %p306_p0 = pnand %p305_p13, %p299_p10 }
  0x20   :  { %309 = shalt.err (!%p306_p0)
}
  0x21   :  { %s354_s8 = smov [#allocation7]   ;;  %s310_s9 = scalar_lea.vmem %s53_s6, 16 }
  0x22   :  { %45 = dma.vmem_to_smem %s43_s28, 32, %s354_s8, [#allocation6]  }
  0x23   :  { %p311_p1 = scmp.ne.s32.totalorder %s53_s6, %s310_s9  ;;  %p315_p2 = scmp.lt.s32.totalorder %s53_s6, %s53_s6 }
  0x24   :  { %p316_p3 = scmp.lt.s32.totalorder %s310_s9, %s310_s9 }
  0x26   :  { %p317_p4 = por %p316_p3, %p315_p2 }
  0x28   :  { %p318_p5 = pnand %p317_p4, %p311_p1 }
  0x2a   :  { %321 = shalt.err (!%p318_p5)
}
  0x2b   :  { %s355_s3 = smov [#allocation8]  }
  0x2c   :  { %55 = dma.vmem_to_smem %s53_s6, 16, %s355_s3, [#allocation9]  }
  0x2d   :  { %344 = dma.done.wait [#allocation4], 64  }
  0x2e   :  { %345 = vsyncadd [#allocation4], 4294967232 }
  0x2f   :  { %346 = dma.done.wait [#allocation6], 48  }
  0x30   :  { %347 = vsyncadd [#allocation6], 4294967248 }
  0x31   :  { %348 = dma.done.wait [#allocation9], 16  }
  0x32   :  { %349 = vsyncadd [#allocation9], 4294967280 }
  0x33   :  { %68 = sfence }
  0x34   :  { %s70_s4 = sld [smem:[#allocation2]]  ;;  %s243_s10 = sld [smem:[#allocation2 + $0x1]]  ;;  %v404_v0 = vld [vmem:[%s495_s0] sm:$0xf]  ;;  %vm223_vm0 = vcmask 1040384  }
  0x35   :  { %s244_s11 = sld [smem:[#allocation2 + $0x2]]  ;;  %s245_s12 = sld [smem:[#allocation2 + $0x3]] }
  0x36   :  { %s399_s13 = sld [smem:[#allocation5]]  ;;  %s247_s15 = sld [smem:[#allocation2 + $0x81]] }
  0x37   :  { %s246_s14 = sld [smem:[#allocation2 + $0x80]]  ;;  %s248_s16 = sld [smem:[#allocation2 + $0x82]] }
  0x38   :  { %s406_s19 = sld [smem:[#allocation2 + $0x83]]  ;;  %s408_s20 = sld [smem:[#allocation2 + $0x100]] }
  0x39   :  { %s410_s21 = sld [smem:[#allocation2 + $0x101]]  ;;  %s412_s22 = sld [smem:[#allocation2 + $0x102]] }
  0x3a   :  { %v71_v1 = vstv %s70_s4  ;;  %v74_v2 = vstv %s243_s10  ;;  %s414_s23 = sld [smem:[#allocation2 + $0x103]]  ;;  %s418_s0 = sld [smem:[#allocation5 + $0x1]] }
  0x3b   :  { %v72_v3 = vmul.f32 %v71_v1, %v404_v0  ;;  %v75_v4 = vmul.f32 %v74_v2, %v404_v0  ;;  %v81_v5 = vstv %s244_s11  ;;  %v88_v6 = vstv %s245_s12  ;;  %s420_s24 = sld [smem:[#allocation2 + $0x180]]  ;;  %s425_s25 = sld [smem:[#allocation2 + $0x181]] }
  0x3c   :  { %v82_v7 = vmul.f32 %v81_v5, %v404_v0  ;;  %v89_v8 = vmul.f32 %v88_v6, %v404_v0  ;;  %v95_v11 = vstv %s399_s13  ;;  %v102_v12 = vstv %s247_s15  ;;  %s427_s26 = sld [smem:[#allocation2 + $0x182]]  ;;  %s434_s2 = sld [smem:[#allocation2 + $0x183]] }
  0x3d   :  { %v99_v9 = vstv %s246_s14  ;;  %v77_v10 = vrot.slane %v75_v4, 1  ;;  %v109_v13 = vstv %s248_s16  ;;  %v103_v16 = vmul.f32 %v102_v12, %v404_v0  ;;  %s436_s1 = sld [smem:[#allocation7]]  ;;  %s443_s27 = sld [smem:[#allocation5 + $0x2]] }
  0x3e   :  { %v84_v14 = vrot.slane %v82_v7, 2  ;;  %v100_v15 = vmul.f32 %v99_v9, %v404_v0  ;;  %v110_v17 = vmul.f32 %v109_v13, %v404_v0  ;;  %v91_v19 = vrot.slane %v89_v8, 3  ;;  %s445_s28 = sld [smem:[#allocation7 + $0x1]]  ;;  %s452_s29 = sld [smem:[#allocation7 + $0x80]] }
  0x3f   :  { %v79_v18 = vadd.f32 %v77_v10, %v72_v3  ;;  %v116_v20 = vstv %s406_s19  ;;  %v127_v21 = vstv %s408_s20  ;;  %v105_v22 = vrot.slane %v103_v16, 1  ;;  %s454_s30 = sld [smem:[#allocation7 + $0x81]]  ;;  %s457_s6 = sld [smem:[#allocation5 + $0x3]] }
  0x40   :  { %v112_v23 = vrot.slane %v110_v17, 2  ;;  %v117_v24 = vmul.f32 %v116_v20, %v404_v0  ;;  %v128_v25 = vmul.f32 %v127_v21, %v404_v0  ;;  %v130_v27 = vstv %s410_s21  ;;  %s461_s7 = sld [smem:[#allocation7 + $0x2]]  ;;  %s472_s9 = sld [smem:[#allocation7 + $0x3]] }
  0x41   :  { %v86_v26 = vadd.f32 %v84_v14, %v79_v18  ;;  %v137_v28 = vstv %s412_s22  ;;  %v144_v29 = vstv %s414_s23  ;;  %v107_v30 = vadd.f32 %v105_v22, %v100_v15  ;;  %s463_s8 = sld [smem:[#allocation7 + $0x82]]  ;;  %s474_s3 = sld [smem:[#allocation7 + $0x83]] }
  0x42   :  { %v119_v31 = vrot.slane %v117_v24, 3  ;;  %v131_v32 = vmul.f32 %v130_v27, %v404_v0  ;;  %v138_v33 = vmul.f32 %v137_v28, %v404_v0  ;;  %v123_v35 = vstv %s418_s0  ;;  %s197_s4 = sld [smem:[#allocation8]]  ;;  %s268_s10 = sld [smem:[#allocation8 + $0x1]] }
  0x43   :  { %v93_v34 = vadd.f32 %v91_v19, %v86_v26  ;;  %v145_v36 = vmul.f32 %v144_v29, %v404_v0  ;;  %v155_v37 = vstv %s420_s24  ;;  %v114_v38 = vadd.f32 %v112_v23, %v107_v30  ;;  %s356_s11 = smov [#allocation10]  }
  0x44   :  { %v133_v39 = vrot.slane %v131_v32, 1  ;;  %v140_v40 = vrot.slane %v138_v33, 2  ;;  %v156_v41 = vmul.f32 %v155_v37, %v404_v0  ;;  %v158_v44 = vstv %s425_s25  ;;  %s232_s12 = sshll.u32 %s356_s11, 4  ;;  %s233_s12 = int_to_ptr.vmem [resolvable:$true] %s232_s12 }
  0x45   :  { %v96_v42 = vadd.f32 %v95_v11, %v93_v34  ;;  %v147_v43 = vrot.slane %v145_v36, 3  ;;  %v165_v45 = vstv %s427_s26  ;;  %v121_v46 = vadd.f32 %v119_v31, %v114_v38  ;;  %s322_s13 = scalar_lea.vmem %s233_s12, 32  ;;  %p327_p7 = scmp.lt.s32.totalorder %s233_s12, %s233_s12 }
  0x46   :  { %v135_v47 = vadd.f32 %v133_v39, %v128_v25  ;;  %v159_v48 = vmul.f32 %v158_v44, %v404_v0  ;;  %v166_v49 = vmul.f32 %v165_v45, %v404_v0  ;;  %v172_v51 = vstv %s434_s2  ;;  %p323_p6 = scmp.ne.s32.totalorder %s233_s12, %s322_s13  ;;  %p328_p8 = scmp.lt.s32.totalorder %s322_s13, %s322_s13 }
  0x47   :  { %v97_v50 = vmax.f32 %v96_v42, 0.0  ;;  %v183_v52 = vstv %s436_s1  ;;  %v124_v53 = vadd.f32 %v123_v35, %v121_v46  ;;  %v151_v57 = vstv %s443_s27 }
  0x48   :  { %v142_v54 = vadd.f32 %v140_v40, %v135_v47  ;;  %v161_v55 = vrot.slane %v159_v48, 1  ;;  %v168_v56 = vrot.slane %v166_v49, 2  ;;  %v173_v58 = vmul.f32 %v172_v51, %v404_v0  ;;  %p329_p9 = por %p328_p8, %p327_p7 }
  0x49   :  { %v186_v59 = vstv %s445_s28  ;;  %v125_v60 = vmax.f32 %v124_v53, 0.0  ;;  %v184_v63 = vmul.f32 %v183_v52, %v97_v50  ;;  %v202_v2 = vstv %s452_s29 }
  0x4a   :  { %v149_v61 = vadd.f32 %v147_v43, %v142_v54  ;;  %v163_v62 = vadd.f32 %v161_v55, %v156_v41  ;;  %v175_v1 = vrot.slane %v173_v58, 3  ;;  %v205_v3 = vstv %s454_s30  ;;  %p330_p10 = pnand %p329_p9, %p323_p6 }
  0x4b   :  { %v187_v6 = vmul.f32 %v186_v59, %v125_v60  ;;  %v203_v0 = vmul.f32 %v202_v2, %v97_v50  ;;  %v179_v7 = vstv %s457_s6  ;;  %v190_v8 = vstv %s461_s7 }
  0x4c   :  { %v152_v4 = vadd.f32 %v151_v57, %v149_v61  ;;  %v170_v5 = vadd.f32 %v168_v56, %v163_v62  ;;  %v206_v9 = vmul.f32 %v205_v3, %v125_v60  ;;  %v209_v10 = vstv %s463_s8 }
  0x4d   :  { %v188_v13 = vadd.f32 %v187_v6, %v184_v63  ;;  %v194_v18 = vstv %s472_s9  ;;  %v213_v19 = vstv %s474_s3  ;;  %v198_v25 = vstv %s197_s4 }
  0x4e   :  { %v153_v11 = vmax.f32 %v152_v4, 0.0  ;;  %v177_v12 = vadd.f32 %v175_v1, %v170_v5  ;;  %v207_v14 = vadd.f32 %v206_v9, %v203_v0  ;;  %v217_v26 = vstv %s268_s10 }
  0x50   :  { %v180_v15 = vadd.f32 %v179_v7, %v177_v12  ;;  %v191_v16 = vmul.f32 %v190_v8, %v153_v11  ;;  %v210_v17 = vmul.f32 %v209_v10, %v153_v11 }
  0x52   :  { %v181_v20 = vmax.f32 %v180_v15, 0.0  ;;  %v192_v21 = vadd.f32 %v191_v16, %v188_v13  ;;  %v211_v22 = vadd.f32 %v210_v17, %v207_v14 }
  0x54   :  { %v195_v23 = vmul.f32 %v194_v18, %v181_v20  ;;  %v214_v24 = vmul.f32 %v213_v19, %v181_v20 }
  0x56   :  { %v196_v27 = vadd.f32 %v195_v23, %v192_v21  ;;  %v215_v28 = vadd.f32 %v214_v24, %v211_v22 }
  0x58   :  { %v199_v29 = vadd.f32 %v198_v25, %v196_v27  ;;  %v218_v30 = vadd.f32 %v217_v26, %v215_v28 }
  0x5a   :  { %v200_v31 = vmax.f32 %v199_v29, 0.0  ;;  %v219_v32 = vmax.f32 %v218_v30, 0.0 }
  0x5c   :  { %v221_v33 = vrot.slane %v219_v32, 7 }
  0x5e   :  { %v224_v34 = vsel %vm223_vm0, %v200_v31, %v221_v33 }
  0x5f   :  { %225 = vst [vmem:[#allocation10] sm:$0x3] %v224_v34 }
  0x60   :  { %333 = shalt.err (!%p330_p10)
}
  0x61   :  { %s334_s16 = scalar_lea.hbm %s500_s5, 32 }
  0x62   :  { %p335_p11 = scmp.ne.s32.totalorder %s500_s5, %s334_s16  ;;  %p338_p12 = scmp.lt.u32.totalorder %s334_s16, %s500_s5 }
  0x64   :  { %p340_p13 = pnand %p338_p12, %p335_p11 }
  0x66   :  { %343 = shalt.err (!%p340_p13)
}
  0x67   :  { %235 = dma.vmem_to_hbm [thread:$0]  %s233_s12, 32, %s500_s5, [#allocation3]  }
  0x68   :  { %350 = dma.done.wait [#allocation3], 32  }
  0x69   :  { %351 = vsyncadd [#allocation3], 4294967264 }
  0x6a   :  { %239 = vsyncpa [#allocation3], 1 }
  0x6b   :  { %240 = vsyncpa [#allocation4], 1 }
  0x6c   :  { %241 = vsyncpa [#allocation6], 1 }
  0x6d   :  { %242 = vsyncpa [#allocation9], 1 }

</bundles_post_ra>
